<compile_context>
chip_gen: v6e
topology: v6e:2x2x1
jax: 0.10.0
libtpu: 0.0.40
codegen_flags: <defaults>
</compile_context>

<pallas_src>
import jax
import jax.numpy as jnp
from jax.experimental import pallas as pl
from jax.experimental.pallas import tpu as pltpu

HIDDEN = 256
HEAD_PAD = 128  # fc3 weight padded to 128 lanes for the MXU; column 0 is the real q


def _make_critic_kernel(state_dim):
    def kernel(s_ref, a_ref, w1_ref, b1_ref, w2_ref, b2_ref, w3_ref, b3_ref,
               out_ref, x_ref):
        # Pack [state | action] into one bf16 VMEM scratch -> fc1 is a single
        # MXU push per output tile (the concat is fused, never materialized in HBM).
        x_ref[:, :state_dim] = s_ref[...].astype(jnp.bfloat16)
        x_ref[:, state_dim:] = a_ref[...].astype(jnp.bfloat16)

        # fc1 + ReLU  (bf16 operands, f32 accumulate; bias/ReLU in f32)
        h = jnp.dot(x_ref[...], w1_ref[...],
                    preferred_element_type=jnp.float32) + b1_ref[...]
        h = jnp.maximum(h, 0.0)

        # fc2 + ReLU
        h = jnp.dot(h.astype(jnp.bfloat16), w2_ref[...],
                    preferred_element_type=jnp.float32) + b2_ref[...]
        h = jnp.maximum(h, 0.0)

        # fc3: 128-lane-padded head for the matmul (same MXU cost as 1-wide),
        # but only the real q column is stored -> 4 B/row HBM writeback.
        q = jnp.dot(h.astype(jnp.bfloat16), w3_ref[...],
                    preferred_element_type=jnp.float32) + b3_ref[...]
        out_ref[...] = q[:, :1].astype(out_ref.dtype)

    return kernel


def prepare_params(params):
    """One-time weight preprocessing (hoisted out of the per-call path).

    Takes PyTorch-layout-equivalent params stored as (in, out) f32 and returns
    bf16 MXU operands with the fc3 head zero-padded to HEAD_PAD lanes.
    """
    hidden, out_dim = params["w3"].shape
    w3 = jnp.zeros((hidden, HEAD_PAD), jnp.float32).at[:, :out_dim].set(params["w3"])
    b3 = jnp.zeros((1, HEAD_PAD), jnp.float32).at[:, :out_dim].set(params["b3"])
    return {
        "w1": params["w1"].astype(jnp.bfloat16),
        "b1": params["b1"].astype(jnp.float32),
        "w2": params["w2"].astype(jnp.bfloat16),
        "b2": params["b2"].astype(jnp.float32),
        "w3": w3.astype(jnp.bfloat16),
        "b3": b3,
    }


def _num_tensorcores():
    # v7x has 2 TensorCores per chip; v5e/v6e have 1. Only used to make sure the
    # "parallel" batch grid has >=2 steps so both v7x cores get work.
    try:
        kind = jax.devices()[0].device_kind.lower()
        if "v7" in kind:
            return 2
    except Exception:
        pass
    return 1


def _pick_batch_tile(batch, block_m):
    ntc = _num_ensorcores() if False else _num_tensorcores()
    if batch > block_m:
        return block_m
    if ntc > 1 and batch > 64:
        # Split so each TensorCore gets at least one tile (8-row aligned).
        per_core = -(-batch // ntc)
        return min(block_m, -(-per_core // 8) * 8)
    # Single full-batch tile (block == full dim, so no 8-alignment requirement).
    return batch


def critic_forward(state, action, prepared, *, block_m=1024):
    """Pallas implementation of Critic.forward.

    state:    (B, state_dim)  float32
    action:   (B, action_dim) float32
    prepared: output of prepare_params()
    returns   (B, 1) float32 Q-values.
    """
    B, state_dim = state.shape
    action_dim = action.shape[1]
    in_dim = state_dim + action_dim
    hidden = prepared["w2"].shape[0]

    tm = _pick_batch_tile(B, block_m)
    grid = (pl.cdiv(B, tm),)

    def resident(arr):
        # Whole-array block + constant index_map: DMA'd once, stays VMEM-resident.
        return pl.BlockSpec(arr.shape, lambda i: (0,) * arr.ndim)

    w1, b1 = prepared["w1"], prepared["b1"]
    w2, b2 = prepared["w2"], prepared["b2"]
    w3, b3 = prepared["w3"], prepared["b3"]

    flops = 2 * B * (in_dim * hidden + hidden * hidden + hidden * HEAD_PAD)
    bytes_accessed = (B * in_dim * 4                                    # inputs
                      + 2 * (w1.size + w2.size + w3.size)               # bf16 weights
                      + 4 * (b1.size + b2.size + b3.size)               # f32 biases
                      + B * 4)                                          # (B,1) output

    return pl.pallas_call(
        _make_critic_kernel(state_dim),
        out_shape=jax.ShapeDtypeStruct((B, 1), jnp.float32),
        grid=grid,
        in_specs=[
            pl.BlockSpec((tm, state_dim), lambda i: (i, 0)),
            pl.BlockSpec((tm, action_dim), lambda i: (i, 0)),
            resident(w1), resident(b1),
            resident(w2), resident(b2),
            resident(w3), resident(b3),
        ],
        out_specs=pl.BlockSpec((tm, 1), lambda i: (i, 0)),
        scratch_shapes=[pltpu.VMEM((tm, in_dim), jnp.bfloat16)],
        compiler_params=pltpu.CompilerParams(
            dimension_semantics=("parallel",)),
        cost_estimate=pl.CostEstimate(
            flops=flops, transcendentals=0, bytes_accessed=bytes_accessed),
    )(state, action, w1, b1, w2, b2, w3, b3)


def init_critic_params(key, state_dim, action_dim, hidden=HIDDEN):
    """PyTorch-style (uniform +/- 1/sqrt(fan_in)) init; weights kept as (in, out) f32."""
    ks = jax.random.split(key, 6)

    def linear(kw, kb, fan_in, fan_out):
        bound = 1.0 / jnp.sqrt(float(fan_in))
        w = jax.random.uniform(kw, (fan_in, fan_out), jnp.float32, -bound, bound)
        b = jax.random.uniform(kb, (1, fan_out), jnp.float32, -bound, bound)
        return w, b

    w1, b1 = linear(ks[0], ks[1], state_dim + action_dim, hidden)
    w2, b2 = linear(ks[2], ks[3], hidden, hidden)
    w3, b3 = linear(ks[4], ks[5], hidden, 1)
    return {"w1": w1, "b1": b1, "w2": w2, "b2": b2, "w3": w3, "b3": b3}


def critic_reference(state, action, params):
    """Pure-JAX reference with the same bf16-operand / f32-accumulate matmuls."""
    def mm(x, w):
        return jnp.dot(x.astype(jnp.bfloat16), w.astype(jnp.bfloat16),
                       preferred_element_type=jnp.float32)

    x = jnp.concatenate([state, action], axis=1)
    h = jnp.maximum(mm(x, params["w1"]) + params["b1"], 0.0)
    h = jnp.maximum(mm(h, params["w2"]) + params["b2"], 0.0)
    return mm(h, params["w3"]) + params["b3"]


if __name__ == "__main__":
    key = jax.random.PRNGKey(0)
    batch, state_dim, action_dim = 2, 16, 4

    k_s, k_a, k_p, k_s2, k_a2 = jax.random.split(key, 5)
    state = jax.random.normal(k_s, (batch, state_dim), jnp.float32)
    action = jax.random.normal(k_a, (batch, action_dim), jnp.float32)
    params = init_critic_params(k_p, state_dim, action_dim)
    prepared = prepare_params(params)

    # Small single-tile case.
    q = critic_forward(state, action, prepared)
    q = jax.block_until_ready(q)
    ref = critic_reference(state, action, params)
    assert q.shape == (batch, 1)
    assert jnp.allclose(q, ref, atol=2e-3, rtol=2e-3), (q, ref)

    # Ragged-batch case: B not a multiple of the tile (3 grid steps, last partial).
    b2 = 20
    state2 = jax.random.normal(k_s2, (b2, state_dim), jnp.float32)
    action2 = jax.random.normal(k_a2, (b2, action_dim), jnp.float32)
    q2 = critic_forward(state2, action2, prepared, block_m=8)
    q2 = jax.block_until_ready(q2)
    ref2 = critic_reference(state2, action2, params)
    assert q2.shape == (b2, 1)
    assert jnp.allclose(q2, ref2, atol=2e-3, rtol=2e-3), (q2, ref2)

    print("KERNEL_OK")
</pallas_src>

<mosaic_0001>
module attributes {stable_mosaic.version = 11 : i64} {
  func.func @kernel(%arg0: i32, %arg1: memref<2x16xf32, #tpu.memory_space<vmem>>, %arg2: memref<2x4xf32, #tpu.memory_space<vmem>>, %arg3: memref<20x256xbf16, #tpu.memory_space<vmem>>, %arg4: memref<1x256xf32, #tpu.memory_space<vmem>>, %arg5: memref<256x256xbf16, #tpu.memory_space<vmem>>, %arg6: memref<1x256xf32, #tpu.memory_space<vmem>>, %arg7: memref<256x128xbf16, #tpu.memory_space<vmem>>, %arg8: memref<1x128xf32, #tpu.memory_space<vmem>>, %arg9: memref<2x1xf32, #tpu.memory_space<vmem>>, %arg10: memref<2x20xbf16, #tpu.memory_space<vmem>>) attributes {dimension_semantics = [#tpu.dimension_semantics<parallel>], iteration_bounds = array<i64: 1>, scalar_prefetch = 0 : i64, scratch_operands = 1 : i64, tpu.core_type = #tpu.core_type<tc>, window_params = [{transform_indices = @transform_0, window_bounds = array<i64: 2, 16>}, {transform_indices = @transform_1, window_bounds = array<i64: 2, 4>}, {pipeline_mode = #tpu.pipeline_mode<synchronous>, transform_indices = @transform_2, window_bounds = array<i64: 20, 256>}, {pipeline_mode = #tpu.pipeline_mode<synchronous>, transform_indices = @transform_3, window_bounds = array<i64: 1, 256>}, {pipeline_mode = #tpu.pipeline_mode<synchronous>, transform_indices = @transform_4, window_bounds = array<i64: 256, 256>}, {pipeline_mode = #tpu.pipeline_mode<synchronous>, transform_indices = @transform_5, window_bounds = array<i64: 1, 256>}, {pipeline_mode = #tpu.pipeline_mode<synchronous>, transform_indices = @transform_6, window_bounds = array<i64: 256, 128>}, {pipeline_mode = #tpu.pipeline_mode<synchronous>, transform_indices = @transform_7, window_bounds = array<i64: 1, 128>}, {transform_indices = @transform_8, window_bounds = array<i64: 2, 1>}]} {
    %c0 = arith.constant 0 : index
    %c0_0 = arith.constant 0 : index
    %0 = vector.load %arg1[%c0, %c0_0] : memref<2x16xf32, #tpu.memory_space<vmem>>, vector<2x16xf32>
    %1 = arith.truncf %0 : vector<2x16xf32> to vector<2x16xbf16>
    %c0_1 = arith.constant 0 : index
    %c0_2 = arith.constant 0 : index
    %2 = vector.load %arg10[%c0_1, %c0_2] : memref<2x20xbf16, #tpu.memory_space<vmem>>, vector<2x16xbf16>
    tpu.vector_store %arg10[%c0_1, %c0_2], %1 {strides = array<i32>} : memref<2x20xbf16, #tpu.memory_space<vmem>>, vector<2x16xbf16>,
    %c0_3 = arith.constant 0 : index
    %c0_4 = arith.constant 0 : index
    %3 = vector.load %arg2[%c0_3, %c0_4] : memref<2x4xf32, #tpu.memory_space<vmem>>, vector<2x4xf32>
    %4 = arith.truncf %3 : vector<2x4xf32> to vector<2x4xbf16>
    %c0_5 = arith.constant 0 : index
    %c16 = arith.constant 16 : index
    %5 = vector.load %arg10[%c0_5, %c16] : memref<2x20xbf16, #tpu.memory_space<vmem>>, vector<2x4xbf16>
    tpu.vector_store %arg10[%c0_5, %c16], %4 {strides = array<i32>} : memref<2x20xbf16, #tpu.memory_space<vmem>>, vector<2x4xbf16>,
    %c0_6 = arith.constant 0 : index
    %c0_7 = arith.constant 0 : index
    %6 = vector.load %arg10[%c0_6, %c0_7] : memref<2x20xbf16, #tpu.memory_space<vmem>>, vector<2x20xbf16>
    %c0_8 = arith.constant 0 : index
    %c0_9 = arith.constant 0 : index
    %7 = vector.load %arg3[%c0_8, %c0_9] : memref<20x256xbf16, #tpu.memory_space<vmem>>, vector<20x256xbf16>
    %cst = arith.constant dense<0.000000e+00> : vector<2x256xf32>
    %8 = tpu.matmul %6, %7, %cst {dimension_numbers = #tpu.dot_dimension_numbers<[1], [0], [0], [1], [0, 0, 1, 1], [], []>} : vector<2x20xbf16>, vector<20x256xbf16>, vector<2x256xf32> -> vector<2x256xf32>
    %c0_10 = arith.constant 0 : index
    %c0_11 = arith.constant 0 : index
    %9 = vector.load %arg4[%c0_10, %c0_11] : memref<1x256xf32, #tpu.memory_space<vmem>>, vector<1x256xf32>
    %10 = vector.broadcast %9 : vector<1x256xf32> to vector<2x256xf32>
    %11 = arith.addf %8, %10 : vector<2x256xf32>
    %cst_12 = arith.constant 0.000000e+00 : f32
    %12 = vector.broadcast %cst_12 : f32 to vector<2x256xf32>
    %13 = arith.maximumf %11, %12 : vector<2x256xf32>
    %14 = arith.truncf %13 : vector<2x256xf32> to vector<2x256xbf16>
    %c0_13 = arith.constant 0 : index
    %c0_14 = arith.constant 0 : index
    %15 = vector.load %arg5[%c0_13, %c0_14] : memref<256x256xbf16, #tpu.memory_space<vmem>>, vector<256x256xbf16>
    %cst_15 = arith.constant dense<0.000000e+00> : vector<2x256xf32>
    %16 = tpu.matmul %14, %15, %cst_15 {dimension_numbers = #tpu.dot_dimension_numbers<[1], [0], [0], [1], [0, 0, 1, 1], [], []>} : vector<2x256xbf16>, vector<256x256xbf16>, vector<2x256xf32> -> vector<2x256xf32>
    %c0_16 = arith.constant 0 : index
    %c0_17 = arith.constant 0 : index
    %17 = vector.load %arg6[%c0_16, %c0_17] : memref<1x256xf32, #tpu.memory_space<vmem>>, vector<1x256xf32>
    %18 = vector.broadcast %17 : vector<1x256xf32> to vector<2x256xf32>
    %19 = arith.addf %16, %18 : vector<2x256xf32>
    %cst_18 = arith.constant 0.000000e+00 : f32
    %20 = vector.broadcast %cst_18 : f32 to vector<2x256xf32>
    %21 = arith.maximumf %19, %20 : vector<2x256xf32>
    %22 = arith.truncf %21 : vector<2x256xf32> to vector<2x256xbf16>
    %c0_19 = arith.constant 0 : index
    %c0_20 = arith.constant 0 : index
    %23 = vector.load %arg7[%c0_19, %c0_20] : memref<256x128xbf16, #tpu.memory_space<vmem>>, vector<256x128xbf16>
    %cst_21 = arith.constant dense<0.000000e+00> : vector<2x128xf32>
    %24 = tpu.matmul %22, %23, %cst_21 {dimension_numbers = #tpu.dot_dimension_numbers<[1], [0], [0], [1], [0, 0, 1, 1], [], []>} : vector<2x256xbf16>, vector<256x128xbf16>, vector<2x128xf32> -> vector<2x128xf32>
    %c0_22 = arith.constant 0 : index
    %c0_23 = arith.constant 0 : index
    %25 = vector.load %arg8[%c0_22, %c0_23] : memref<1x128xf32, #tpu.memory_space<vmem>>, vector<1x128xf32>
    %26 = vector.broadcast %25 : vector<1x128xf32> to vector<2x128xf32>
    %27 = arith.addf %24, %26 : vector<2x128xf32>
    %28 = vector.extract_strided_slice %27 {offsets = [0, 0], sizes = [2, 1], strides = [1, 1]} : vector<2x128xf32> to vector<2x1xf32>
    %c0_24 = arith.constant 0 : index
    %c0_25 = arith.constant 0 : index
    %29 = vector.load %arg9[%c0_24, %c0_25] : memref<2x1xf32, #tpu.memory_space<vmem>>, vector<2x1xf32>
    tpu.vector_store %arg9[%c0_24, %c0_25], %28 {strides = array<i32>} : memref<2x1xf32, #tpu.memory_space<vmem>>, vector<2x1xf32>,
    return
  }
  func.func @transform_0(%arg0: i32) -> (i32, i32) {
    %c0_i32 = arith.constant 0 : i32
    %c0_i32_0 = arith.constant 0 : i32
    return %arg0, %c0_i32 : i32, i32
  }
  func.func @transform_1(%arg0: i32) -> (i32, i32) {
    %c0_i32 = arith.constant 0 : i32
    %c0_i32_0 = arith.constant 0 : i32
    return %arg0, %c0_i32 : i32, i32
  }
  func.func @transform_2(%arg0: i32) -> (i32, i32) {
    %c0_i32 = arith.constant 0 : i32
    %c0_i32_0 = arith.constant 0 : i32
    %c0_i32_1 = arith.constant 0 : i32
    return %c0_i32, %c0_i32_0 : i32, i32
  }
  func.func @transform_3(%arg0: i32) -> (i32, i32) {
    %c0_i32 = arith.constant 0 : i32
    %c0_i32_0 = arith.constant 0 : i32
    %c0_i32_1 = arith.constant 0 : i32
    return %c0_i32, %c0_i32_0 : i32, i32
  }
  func.func @transform_4(%arg0: i32) -> (i32, i32) {
    %c0_i32 = arith.constant 0 : i32
    %c0_i32_0 = arith.constant 0 : i32
    %c0_i32_1 = arith.constant 0 : i32
    return %c0_i32, %c0_i32_0 : i32, i32
  }
  func.func @transform_5(%arg0: i32) -> (i32, i32) {
    %c0_i32 = arith.constant 0 : i32
    %c0_i32_0 = arith.constant 0 : i32
    %c0_i32_1 = arith.constant 0 : i32
    return %c0_i32, %c0_i32_0 : i32, i32
  }
  func.func @transform_6(%arg0: i32) -> (i32, i32) {
    %c0_i32 = arith.constant 0 : i32
    %c0_i32_0 = arith.constant 0 : i32
    %c0_i32_1 = arith.constant 0 : i32
    return %c0_i32, %c0_i32_0 : i32, i32
  }
  func.func @transform_7(%arg0: i32) -> (i32, i32) {
    %c0_i32 = arith.constant 0 : i32
    %c0_i32_0 = arith.constant 0 : i32
    %c0_i32_1 = arith.constant 0 : i32
    return %c0_i32, %c0_i32_0 : i32, i32
  }
  func.func @transform_8(%arg0: i32) -> (i32, i32) {
    %c0_i32 = arith.constant 0 : i32
    %c0_i32_0 = arith.constant 0 : i32
    return %arg0, %c0_i32 : i32, i32
  }
}

</mosaic_0001>

<bundles_post_ra>
// kernel: tpu_custom_call.1
= control target key start
LH: loop header
LB: loop body
LE: loop exit
PB: predicated region body
PF: predicated region fallthrough
CT: control target
= control target key end

     0   :  { %13 = vsyncpa [#allocation4], 0  ;;  %s993_s0 = inlined_call_operand.hbm [shape: f32[2,16], index: 0, kind: input, shape index: {}]   ;;  %s994_s1 = inlined_call_operand.hbm [shape: f32[2,4], index: 1, kind: input, shape index: {}]   ;;  %s995_s2 = inlined_call_operand.hbm [shape: bf16[20,256], index: 2, kind: input, shape index: {}]   ;;  %s996_s3 = inlined_call_operand.vmem [shape: f32[1,256], index: 3, kind: input, shape index: {}]   ;;  %s997_s4 = inlined_call_operand.hbm [shape: bf16[256,256], index: 4, kind: input, shape index: {}]   ;;  %s998_s5 = inlined_call_operand.vmem [shape: f32[1,256], index: 5, kind: input, shape index: {}]   ;;  %s999_s6 = inlined_call_operand.hbm [shape: bf16[256,128], index: 6, kind: input, shape index: {}]   ;;  %s1000_s7 = inlined_call_operand.vmem [shape: f32[1,128], index: 7, kind: input, shape index: {}]   ;;  %s1001_s8 = inlined_call_operand.vmem [shape: f32[2,1], index: 8, kind: output, shape index: {}]  }
   0x1   :  { %14 = vsyncpa [#allocation6], 0 }
   0x2   :  { %15 = vsyncpa [#allocation9], 0  ;;  %s904_s27 = smov [#allocation5]  }
   0x3   :  { %s32_s28 = sshll.u32 %s904_s27, 4  ;;  %s33_s28 = int_to_ptr.vmem [resolvable:$true] %s32_s28 }
   0x4   :  { %s806_s29 = scalar_lea.vmem %s33_s28, 32  ;;  %p811_p1 = scmp.lt.s32.totalorder %s33_s28, %s33_s28 }
   0x5   :  { %p807_p0 = scmp.ne.s32.totalorder %s33_s28, %s806_s29  ;;  %p812_p2 = scmp.lt.s32.totalorder %s806_s29, %s806_s29 }
   0x7   :  { %p813_p3 = por %p812_p2, %p811_p1 }
   0x9   :  { %p814_p4 = pnand %p813_p3, %p807_p0 }
   0xb   :  { %817 = shalt.err (!%p814_p4)
}
   0xc   :  { %35 = dma.hbm_to_vmem [thread:$0]  %s994_s1, 32, %s33_s28, [#allocation6]  }
   0xd   :  { %s905_s10 = smov [#allocation8]   ;;  %s906_s12 = smov [#allocation3]  }
   0xe   :  { %s55_s11 = sshll.u32 %s905_s10, 4  ;;  %s22_s13 = sshll.u32 %s906_s12, 4  ;;  %s56_s11 = int_to_ptr.vmem [resolvable:$true] %s55_s11  ;;  %s23_s13 = int_to_ptr.vmem [resolvable:$true] %s22_s13 }
   0xf   :  { %s826_s14 = scalar_lea.vmem %s56_s11, 4096  ;;  %p831_p6 = scmp.lt.s32.totalorder %s56_s11, %s56_s11 }
  0x10   :  { %p827_p5 = scmp.ne.s32.totalorder %s56_s11, %s826_s14  ;;  %p832_p7 = scmp.lt.s32.totalorder %s826_s14, %s826_s14 }
  0x12   :  { %p833_p8 = por %p832_p7, %p831_p6 }
  0x14   :  { %p834_p9 = pnand %p833_p8, %p827_p5 }
  0x16   :  { %837 = shalt.err (!%p834_p9)
}
  0x17   :  { %s907_s15 = smov 128   ;;  %s908_s16 = smov 8  }
  0x18   :  { %61 = dma.hbm_to_vmem [thread:$0]  %s997_s4, 4096, %s56_s11, [#allocation9], %s907_s15, %s907_s15, %s908_s16  }
  0x19   :  { %s846_s1 = scalar_lea.vmem %s23_s13, 32  ;;  %p851_p11 = scmp.lt.s32.totalorder %s23_s13, %s23_s13 }
  0x1a   :  { %p847_p10 = scmp.ne.s32.totalorder %s23_s13, %s846_s1  ;;  %p852_p12 = scmp.lt.s32.totalorder %s846_s1, %s846_s1 }
  0x1c   :  { %p853_p13 = por %p852_p12, %p851_p11 }
  0x1e   :  { %p854_p0 = pnand %p853_p13, %p847_p10 }
  0x20   :  { %857 = shalt.err (!%p854_p0)
}
  0x21   :  { %25 = dma.hbm_to_vmem [thread:$0]  %s993_s0, 32, %s23_s13, [#allocation4]  }
  0x22   :  { %s909_s21 = smov [#allocation7]   ;;  %s910_s23 = smov [#allocation10]  }
  0x23   :  { %s41_s22 = sshll.u32 %s909_s21, 4  ;;  %s69_s24 = sshll.u32 %s910_s23, 4  ;;  %s42_s22 = int_to_ptr.vmem [resolvable:$true] %s41_s22  ;;  %s70_s24 = int_to_ptr.vmem [resolvable:$true] %s69_s24 }
  0x24   :  { %s866_s25 = scalar_lea.vmem %s42_s22, 384  ;;  %p871_p2 = scmp.lt.s32.totalorder %s42_s22, %s42_s22 }
  0x25   :  { %p867_p1 = scmp.ne.s32.totalorder %s42_s22, %s866_s25  ;;  %p872_p3 = scmp.lt.s32.totalorder %s866_s25, %s866_s25 }
  0x27   :  { %p873_p4 = por %p872_p3, %p871_p2 }
  0x29   :  { %p874_p5 = pnand %p873_p4, %p867_p1 }
  0x2b   :  { %877 = shalt.err (!%p874_p5)
}
  0x2c   :  { %47 = dma.hbm_to_vmem [thread:$0]  %s995_s2, 384, %s42_s22, [#allocation6], %s907_s15, %s907_s15, %s908_s16  }
  0x2d   :  { %s886_s27 = scalar_lea.vmem %s70_s24, 2048  ;;  %p891_p7 = scmp.lt.s32.totalorder %s70_s24, %s70_s24 }
  0x2e   :  { %p887_p6 = scmp.ne.s32.totalorder %s70_s24, %s886_s27  ;;  %p892_p8 = scmp.lt.s32.totalorder %s886_s27, %s886_s27 }
  0x30   :  { %p893_p9 = por %p892_p8, %p891_p7 }
  0x32   :  { %p894_p10 = pnand %p893_p9, %p887_p6 }
  0x34   :  { %897 = shalt.err (!%p894_p10)
}
  0x35   :  { %s911_s0 = smov 64   ;;  %s912_s28 = smov 4  }
  0x36   :  { %75 = dma.hbm_to_vmem [thread:$0]  %s999_s6, 2048, %s70_s24, [#allocation9], %s911_s0, %s911_s0, %s912_s28  }
  0x37   :  { %898 = dma.done.wait [#allocation4], 32  }
  0x38   :  { %899 = vsyncadd [#allocation4], 4294967264 }
  0x39   :  { %900 = dma.done.wait [#allocation6], 416  }
  0x3a   :  { %901 = vsyncadd [#allocation6], 4294966880 }
  0x3b   :  { %902 = dma.done.wait [#allocation9], 6144  }
  0x3c   :  { %903 = vsyncadd [#allocation9], 4294961152  ;;  %v104_v0 = vlaneseq  ;;  %v913_v1 = vmov 1966171168   ;;  %v914_v4 = vmov 0   ;;  %vm96_vm0 = vcmask 122880  }
  0x3d   :  { %v102_v2 = vunpack.c.l.s4 %v913_v1  ;;  %194 = vmatprep.mubr.bf16.mxu0 %v914_v4  ;;  %vm155_vm1 = vcmask 1041408   ;;  %v98_v7 = vld [vmem:[#allocation5] sm:$0x3]  ;;  %v94_v8 = vld [vmem:[#allocation3] sm:$0x3]  ;;  %s915_s2 = smov 16  }
  0x3e   :  { %v976_v3 = vshrl.u32 %v104_v0, 7  ;;  %v123_v9 = vld [vmem:[#allocation7 + $0x10] sm:$0x33]  ;;  %v99_v10 = vpack.c.bf16 %v98_v7, %v98_v7  ;;  %v95_v11 = vpack.c.bf16 %v94_v8, %v94_v8  ;;  %v731_v14 = vld [vmem:[#allocation7 + $0x4] ss:$8 sps:$4 sm:$0xff]   ;;  %vm118_vm2 = vcmask 155776  }
  0x3f   :  { %v103_v5 = vunpack.c.0.s8 %v102_v2  ;;  %v643_v12 = vcombine.high %v123_v9, %v123_v9  ;;  %v642_v13 = vcombine.low %v123_v9, %v123_v9  ;;  %v734_v17 = vld [vmem:[#allocation8 + $0x74] ss:$8 sps:$4 sm:$0xff]   ;;  %v736_v18 = vld [vmem:[#allocation8 + $0x70] ss:$8 sps:$4 sm:$0xff]   ;;  %v737_v20 = vld [vmem:[#allocation8 + $0x64] ss:$8 sps:$4 sm:$0xff]  }
  0x40   :  { %97 = vst.msk [vmem:[#allocation2] sm:$0x1] %vm96_vm0, %v95_v11  ;;  %v733_v19 = vld [vmem:[#allocation7] ss:$8 sps:$4 sm:$0xff]   ;;  %411 = vmatprep.subr.bf16.mxu1 %v734_v17  ;;  %v740_v23 = vld [vmem:[#allocation8 + $0x54] ss:$8 sps:$4 sm:$0xff]  }
  0x41   :  { %v106_v6 = vsub.s32 %v103_v5, %v976_v3  ;;  %644 = vmatprep.subr.msk.bf16.mxu0 %vm155_vm1, %v643_v12  ;;  %v157_v16 = vsel %vm155_vm1, %v642_v13, 0  ;;  %412 = vmatpush1.bf16.msra.mxu1 %v736_v18  ;;  %v739_v22 = vld [vmem:[#allocation8 + $0x60] ss:$8 sps:$4 sm:$0xff]   ;;  %v742_v24 = vld [vmem:[#allocation8 + $0x50] ss:$8 sps:$4 sm:$0xff]   ;;  %vm151_vm3 = vcmask 162816  }
  0x42   :  { %175 = vmatpush1.bf16.msra.mxu0 %v157_v16  ;;  %413 = vmatprep.subr.bf16.mxu1 %v737_v20  ;;  %v743_v25 = vld [vmem:[#allocation8 + $0x44] ss:$8 sps:$4 sm:$0xff]   ;;  %v745_v26 = vld [vmem:[#allocation8 + $0x40] ss:$8 sps:$4 sm:$0xff]   ;;  %v746_v27 = vld [vmem:[#allocation8 + $0x34] ss:$8 sps:$4 sm:$0xff]  }
  0x43   :  { %v107_v15 = vrot.slane %v99_v10, %v106_v6  ;;  %176 = vmatprep.subr.bf16.mxu0 %v731_v14  ;;  %v748_v28 = vld [vmem:[#allocation8 + $0x30] ss:$8 sps:$4 sm:$0xff]   ;;  %v749_v29 = vld [vmem:[#allocation8 + $0x24] ss:$8 sps:$4 sm:$0xff]   ;;  %v751_v30 = vld [vmem:[#allocation8 + $0x20] ss:$8 sps:$4 sm:$0xff]  }
  0x44   :  { %v752_v31 = vld [vmem:[#allocation8 + $0x14] ss:$8 sps:$4 sm:$0xff]   ;;  %v754_v32 = vld [vmem:[#allocation8 + $0x10] ss:$8 sps:$4 sm:$0xff]   ;;  %v755_v33 = vld [vmem:[#allocation8 + $0x4] ss:$8 sps:$4 sm:$0xff]  }
  0x45   :  { %v114_v21 = vrot.slane %v107_v15, %v106_v6  ;;  %414 = vmatpush1.bf16.msra.mxu1 %v739_v22  ;;  %v757_v34 = vld [vmem:[#allocation8] ss:$8 sps:$4 sm:$0xff]   ;;  %v758_v35 = vld [vmem:[#allocation8 + $0xf4] ss:$8 sps:$4 sm:$0xff]   ;;  %v760_v36 = vld [vmem:[#allocation8 + $0xf0] ss:$8 sps:$4 sm:$0xff]  }
  0x46   :  { %177 = vmatpush1.bf16.msra.mxu0 %v733_v19  ;;  %415 = vmatprep.subr.bf16.mxu1 %v740_v23  ;;  %v761_v37 = vld [vmem:[#allocation8 + $0xe4] ss:$8 sps:$4 sm:$0xff]   ;;  %v763_v38 = vld [vmem:[#allocation8 + $0xe0] ss:$8 sps:$4 sm:$0xff]   ;;  %v764_v39 = vld [vmem:[#allocation8 + $0xd4] ss:$8 sps:$4 sm:$0xff]  }
  0x47   :  { %115 = vrot.lane.b32.xlu0 %v114_v21, %s915_s2  ;;  %v766_v40 = vld [vmem:[#allocation8 + $0xd0] ss:$8 sps:$4 sm:$0xff]   ;;  %v767_v41 = vld [vmem:[#allocation8 + $0xc4] ss:$8 sps:$4 sm:$0xff]   ;;  %v769_v42 = vld [vmem:[#allocation8 + $0xc0] ss:$8 sps:$4 sm:$0xff]  }
  0x48   :  { %v770_v43 = vld [vmem:[#allocation8 + $0xb4] ss:$8 sps:$4 sm:$0xff]   ;;  %v772_v44 = vld [vmem:[#allocation8 + $0xb0] ss:$8 sps:$4 sm:$0xff]   ;;  %v773_v45 = vld [vmem:[#allocation8 + $0xa4] ss:$8 sps:$4 sm:$0xff]  }
  0x49   :  { %416 = vmatpush1.bf16.msra.mxu1 %v742_v24  ;;  %v775_v46 = vld [vmem:[#allocation8 + $0xa0] ss:$8 sps:$4 sm:$0xff]   ;;  %v776_v49 = vld [vmem:[#allocation8 + $0x94] ss:$8 sps:$4 sm:$0xff]   ;;  %v778_v50 = vld [vmem:[#allocation8 + $0x90] ss:$8 sps:$4 sm:$0xff]  }
  0x4a   :  { %417 = vmatprep.subr.bf16.mxu1 %v743_v25  ;;  %v779_v51 = vld [vmem:[#allocation8 + $0x84] ss:$8 sps:$4 sm:$0xff]   ;;  %v781_v52 = vld [vmem:[#allocation8 + $0x80] ss:$8 sps:$4 sm:$0xff]   ;;  %v782_v53 = vld [vmem:[#allocation10 + $0x78] sm:$0xff]   ;;  %v128_v1 = vsub.s32 0, %v976_v3 }
  0x4b   :  { %v783_v54 = vld [vmem:[#allocation10 + $0x38] sm:$0xff]   ;;  %v784_v55 = vld [vmem:[#allocation10 + $0x70] sm:$0xff]   ;;  %695 = vmatprep.subr.bf16.mxu0 %v782_v53  ;;  %v786_v57 = vld [vmem:[#allocation10 + $0x68] sm:$0xff]   ;;  %v132_v4 = vsub.s32 1, %v976_v3  ;;  %vm631_vm4 = vcmask 1024  }
  0x4c   :  { %v785_v56 = vld [vmem:[#allocation10 + $0x30] sm:$0xff]   ;;  %v787_v58 = vld [vmem:[#allocation10 + $0x28] sm:$0xff]   ;;  %v788_v59 = vld [vmem:[#allocation10 + $0x60] sm:$0xff]  }
  0x4d   :  { %418 = vmatpush1.bf16.msra.mxu1 %v745_v26  ;;  %v789_v60 = vld [vmem:[#allocation10 + $0x20] sm:$0xff]   ;;  %v790_v61 = vld [vmem:[#allocation10 + $0x58] sm:$0xff]   ;;  %v792_v63 = vld [vmem:[#allocation10 + $0x50] sm:$0xff]  }
  0x4e   :  { %419 = vmatprep.subr.bf16.mxu1 %v746_v27  ;;  %v791_v62 = vld [vmem:[#allocation10 + $0x18] sm:$0xff]   ;;  %v793_v0 = vld [vmem:[#allocation10 + $0x10] sm:$0xff]   ;;  %v124_v2 = vld [vmem:[%s996_s3] sm:$0x3] }
  0x4f   :  { %v129_v5 = vrot.slane %v124_v2, %v128_v1  ;;  %v133_v6 = vrot.slane %v124_v2, %v132_v4  ;;  %v794_v17 = vld [vmem:[#allocation10 + $0x48] sm:$0xff]   ;;  %v796_v19 = vld [vmem:[#allocation10 + $0x40] sm:$0xff]  }
  0x50   :  { %v795_v18 = vld [vmem:[#allocation10 + $0x8] sm:$0xff]   ;;  %v797_v3 = vld [vmem:[#allocation10] sm:$0xff]  }
  0x51   :  { %420 = vmatpush1.bf16.msra.mxu1 %v748_v28  ;;  %v239_v20 = vld [vmem:[%s998_s5] sm:$0x3] }
  0x52   :  { %421 = vmatprep.subr.bf16.mxu1 %v749_v29  ;;  %v244_v21 = vrot.slane %v239_v20, %v128_v1  ;;  %v248_v22 = vrot.slane %v239_v20, %v132_v4 }
  0x55   :  { %422 = vmatpush1.bf16.msra.mxu1 %v751_v30 }
  0x56   :  { %423 = vmatprep.subr.bf16.mxu1 %v752_v31 }
  0x59   :  { %424 = vmatpush1.bf16.msra.mxu1 %v754_v32 }
  0x5a   :  { %425 = vmatprep.subr.bf16.mxu1 %v755_v33 }
  0x5d   :  { %426 = vmatpush1.bf16.msra.mxu1 %v757_v34  ;;  %v678_v34 = vld [vmem:[%s1000_s7] ss:$0 sm:$0xff] }
  0x5e   :  { %427 = vmatprep.subr.bf16.mxu1 %v758_v35 }
  0x61   :  { %428 = vmatpush2.bf16.msra.mxu1 %v760_v36 }
  0x62   :  { %429 = vmatprep.subr.bf16.mxu1 %v761_v37 }
  0x65   :  { %430 = vmatpush2.bf16.msra.mxu1 %v763_v38 }
  0x66   :  { %431 = vmatprep.subr.bf16.mxu1 %v764_v39 }
  0x69   :  { %432 = vmatpush2.bf16.msra.mxu1 %v766_v40 }
  0x6a   :  { %433 = vmatprep.subr.bf16.mxu1 %v767_v41 }
  0x6d   :  { %434 = vmatpush2.bf16.msra.mxu1 %v769_v42 }
  0x6e   :  { %435 = vmatprep.subr.bf16.mxu1 %v770_v43 }
  0x71   :  { %436 = vmatpush2.bf16.msra.mxu1 %v772_v44 }
  0x72   :  { %437 = vmatprep.subr.bf16.mxu1 %v773_v45 }
  0x75   :  { %438 = vmatpush2.bf16.msra.mxu1 %v775_v46 }
  0x76   :  { %439 = vmatprep.subr.bf16.mxu1 %v776_v49 }
  0x79   :  { %440 = vmatpush2.bf16.msra.mxu1 %v778_v50 }
  0x7a   :  { %441 = vmatprep.subr.bf16.mxu1 %v779_v51 }
  0x7d   :  { %442 = vmatpush2.bf16.msra.mxu1 %v781_v52 }
  0xb9   :  { %v116_v47 = vpop.permute.xlu0 %115 }
  0xba   :  { %119 = vst.msk [vmem:[#allocation2] sm:$0x1] %vm118_vm2, %v116_v47 }
  0xc1   :  { %v120_v48 = vld [vmem:[#allocation2] sm:$0x1] }
  0xc2   :  { %645 = vmatmul.mubr.msk.bf16.vlgmr.msra.gmra.mxu0 %vm151_vm3, %v120_v48 }
  0xc3   :  { %696 = vmatpush3.bf16.msra.mxu0 %v783_v54 }
  0xc4   :  { %697 = vmatprep.subr.bf16.mxu0 %v784_v55 }
  0xc7   :  { %698 = vmatpush3.bf16.msra.mxu0 %v785_v56 }
  0xc8   :  { %699 = vmatprep.subr.bf16.mxu0 %v786_v57 }
  0xcb   :  { %700 = vmatpush3.bf16.msra.mxu0 %v787_v58 }
  0xcc   :  { %701 = vmatprep.subr.bf16.mxu0 %v788_v59 }
  0xcf   :  { %702 = vmatpush3.bf16.msra.mxu0 %v789_v60 }
  0xd0   :  { %703 = vmatprep.subr.bf16.mxu0 %v790_v61 }
  0xd3   :  { %704 = vmatpush3.bf16.msra.mxu0 %v791_v62 }
  0xd4   :  { %705 = vmatprep.subr.bf16.mxu0 %v792_v63 }
  0xd7   :  { %706 = vmatpush3.bf16.msra.mxu0 %v793_v0 }
  0xd8   :  { %707 = vmatprep.subr.bf16.mxu0 %v794_v17 }
  0xdb   :  { %708 = vmatpush3.bf16.msra.mxu0 %v795_v18 }
  0xdc   :  { %709 = vmatprep.subr.bf16.mxu0 %v796_v19 }
  0xdf   :  { %710 = vmatpush3.bf16.msra.mxu0 %v797_v3 }
 0x182   :  { %v196_v7 = vpop.f32.mrf.mxu0 }
 0x183   :  { %v197_v8 = vadd.f32 %v196_v7, %v129_v5 }
 0x184   :  { %v198_v9 = vpop.f32.mrf.mxu0 }
 0x185   :  { %v199_v10 = vadd.f32 %v198_v9, %v133_v6  ;;  %v203_v11 = vmax.f32 %v197_v8, 0.0 }
 0x186   :  { %v200_v12 = vpop.f32.mrf.mxu0 }
 0x187   :  { %v204_v13 = vmax.f32 %v199_v10, 0.0  ;;  %v205_v16 = vpack.c.bf16 %v203_v11, %v203_v11 }
 0x188   :  { %v201_v14 = vpop.f32.mrf.mxu0 }
 0x189   :  { %v206_v15 = vpack.c.bf16 %v204_v13, %v204_v13 }
 0x18b   :  { %443 = vmatprep.mubr.bf16.mxu1 %v206_v15 }
 0x18c   :  { %444 = vmatmul.mubr.bf16.vlgmr.msra.gmra.mxu1 %v205_v16 }
 0x24c   :  { %v445_v23 = vpop.f32.mrf.mxu1 }
 0x24d   :  { %v446_v24 = vadd.f32 %v445_v23, %v244_v21 }
 0x24e   :  { %v447_v25 = vpop.f32.mrf.mxu1 }
 0x24f   :  { %v448_v26 = vadd.f32 %v447_v25, %v248_v22  ;;  %v452_v27 = vmax.f32 %v446_v24, 0.0 }
 0x250   :  { %v449_v28 = vpop.f32.mrf.mxu1 }
 0x251   :  { %v453_v29 = vmax.f32 %v448_v26, 0.0  ;;  %v454_v32 = vpack.c.bf16 %v452_v27, %v452_v27 }
 0x252   :  { %v450_v30 = vpop.f32.mrf.mxu1 }
 0x253   :  { %v455_v31 = vpack.c.bf16 %v453_v29, %v453_v29 }
 0x255   :  { %623 = vmatprep.mubr.bf16.mxu0 %v455_v31 }
 0x256   :  { %624 = vmatmul.mubr.bf16.vlgmr.msra.gmra.mxu0 %v454_v32 }
 0x316   :  { %v711_v33 = vpop.f32.mrf.mxu0 }
 0x318   :  { %v712_v35 = vpop.f32.mrf.mxu0 }
 0x319   :  { %v713_v36 = vadd.f32 %v712_v35, %v711_v33 }
 0x31a   :  { %v714_v37 = vpop.f32.mrf.mxu0 }
 0x31b   :  { %v626_v38 = vadd.f32 %v713_v36, %v678_v34 }
 0x31c   :  { %v715_v39 = vpop.f32.mrf.mxu0 }
 0x31d   :  { %632 = vst.msk [vmem:[%s1001_s8] sm:$0x3] %vm631_vm4, %v626_v38 }
 0x31e   :  { %637 = vsyncpa [#allocation4], 1 }
 0x31f   :  { %638 = vsyncpa [#allocation6], 1 }
 0x320   :  { %639 = vsyncpa [#allocation9], 1 }

</bundles_post_ra>
